<compile_context>
chip_gen: v6e
topology: v6e:2x2x1
jax: 0.10.0
libtpu: 0.0.40
codegen_flags: <defaults>
</compile_context>

<pallas_src>
import functools

import jax
import jax.numpy as jnp
from jax.experimental import pallas as pl
from jax.experimental.pallas import tpu as pltpu

EPS = 1e-8


def _avg_nonzero_kernel(x_ref, o_ref, sum_acc, cnt_acc, *, use_mxu_mask):
    k = pl.program_id(1)

    @pl.when(k == 0)
    def _init():
        sum_acc[...] = jnp.zeros_like(sum_acc)
        cnt_acc[...] = jnp.zeros_like(cnt_acc)

    x = x_ref[...]                                   # (TB, TN, D), native dtype
    tb, tn, d = x.shape

    if use_mxu_mask:
        # Row sums on the MXU: x2 @ ones(D, D) puts the row sum in EVERY lane,
        # so the 0/1 mask is already lane-dense -> no XLU lane-reduce and no
        # lane-broadcast (the binding slots on 2-XLU v6e/v7x at D ~ 128).
        # tn is always a multiple of 8, so the leading-dim collapse is a
        # sublane-aligned relabeling (no relayout).
        x2 = x.reshape(tb * tn, d)
        ones_dd = jnp.ones((d, d), x.dtype)
        rs = jnp.dot(x2, ones_dd, preferred_element_type=jnp.float32)
        nzf = (rs != 0.0).astype(x.dtype).reshape(tb, tn, d)       # lane-dense 0/1
    else:
        # Fallback XLU path (tiny D or very large D, where it is not binding).
        rs = jnp.sum(x, axis=-1, keepdims=True, dtype=jnp.float32)  # (TB, TN, 1)
        nzf = (rs != 0.0).astype(x.dtype)

    # Masked partial sums with f32 accumulation; no full-tile f32 upcast of x.
    masked = x * nzf                                                # (TB, TN, D)
    sum_acc[...] += jnp.sum(masked, axis=1, dtype=jnp.float32)      # (TB, D)
    # MXU path: (TB, D) counts, all lanes equal.  XLU path: (TB, 1) partial
    # broadcast into every lane by the +=.
    cnt_acc[...] += jnp.sum(nzf, axis=1, dtype=jnp.float32)

    @pl.when(k == pl.num_programs(1) - 1)
    def _finalize():
        avg = sum_acc[...] / (cnt_acc[...] + EPS)
        # torch.nan_to_num(nan=0, posinf=1, neginf=-1).  With the +eps
        # denominator the division never creates new NaN/Inf for finite
        # inputs; these remaps only fire if the input already carries inf/nan.
        avg = jnp.where(jnp.isnan(avg), 0.0, avg)
        avg = jnp.where(avg == jnp.inf, 1.0, avg)
        avg = jnp.where(avg == -jnp.inf, -1.0, avg)
        o_ref[...] = avg.astype(o_ref.dtype)


def _choose_tiles(B, N, D, itemsize, target_tile_bytes):
    # v7x has only 64 MiB VMEM per TensorCore: keep each input buffer <= 8 MiB
    # regardless of what the caller asks (double-buffering => <= 16 MiB total).
    target = int(min(max(target_tile_bytes, 8 * 1024), 8 * 1024 * 1024))
    row_bytes = D * itemsize
    n_pad8 = pl.cdiv(N, 8) * 8      # keep the N tile a multiple of 8 always

    # N tile: full (8-padded) N if an (8, N, D) tile fits the budget, otherwise
    # split N so the "arbitrary" grid axis accumulates into VMEM scratch.
    if 8 * n_pad8 * row_bytes <= target:
        tn = n_pad8
    else:
        tn = max(8, (target // (8 * row_bytes)) // 8 * 8)
        tn = min(tn, n_pad8)

    # Batch tile: multiple of 8 (sublane-dense, unmasked output stores), as big
    # as fits the budget ...
    tb = max(8, (target // (tn * row_bytes)) // 8 * 8)
    tb = min(tb, pl.cdiv(B, 8) * 8)
    # ... but leave >= 2 batch grid steps when B allows, so both v7x
    # TensorCores get work under dimension_semantics=("parallel", ...).
    if B > 8:
        tb = min(tb, max(8, (pl.cdiv(B, 2) // 8) * 8))
    return tb, tn


def average_non_zero_vectors(x, *, target_tile_bytes=4 * 1024 * 1024):
    """x: (B, N, D) float array -> (B, D)."""
    B, N, D = x.shape
    itemsize = jnp.dtype(x.dtype).itemsize

    tb, tn = _choose_tiles(B, N, D, itemsize, target_tile_bytes)
    b_pad = pl.cdiv(B, tb) * tb
    n_pad = pl.cdiv(N, tn) * tn
    if (b_pad, n_pad) != (B, N):
        # Zero padding: padded vectors have sum 0 -> mask 0 -> no contribution;
        # fully padded batch rows give 0 / (0 + eps) = 0 and are sliced off.
        x = jnp.pad(x, ((0, b_pad - B), (0, n_pad - N), (0, 0)))

    # MXU ones-matmul mask pays off where the XLU lane-reduce would bind
    # (D around 128-512).  For tiny D the matmul padding isn't worth it and for
    # very large D the kernel is safely HBM-bound either way.
    # TODO(synk): for D < 128 a wrapper-side lane-dense repack (folding several
    # N rows into the 128-lane dim) would recover the ~128/D wasted lane
    # bandwidth; not done here.
    use_mxu_mask = 64 <= D <= 512

    in_tile_bytes = tb * tn * D * itemsize
    out_tile_bytes = tb * D * itemsize
    scratch_bytes = 2 * tb * D * 4
    ones_bytes = D * D * itemsize if use_mxu_mask else 0
    # Double-buffered input + output + scratch + f32 intermediates + headroom,
    # clamped to a range that is legal on v5e (128 MiB), v6e (128 MiB) and
    # v7x (64 MiB physical, 32 MiB scoped default).
    vmem_limit = int(min(64 * 1024 * 1024,
                         max(32 * 1024 * 1024,
                             2 * in_tile_bytes + 2 * tb * tn * D * 4
                             + 2 * out_tile_bytes + scratch_bytes + ones_bytes
                             + (4 << 20))))

    flops = 2 * b_pad * n_pad * D * (D if use_mxu_mask else 1) + 4 * b_pad * n_pad * D
    cost = pl.CostEstimate(
        flops=int(flops),
        transcendentals=0,
        bytes_accessed=int(b_pad * n_pad * D * itemsize + b_pad * D * itemsize),
    )

    kernel = functools.partial(_avg_nonzero_kernel, use_mxu_mask=use_mxu_mask)

    out = pl.pallas_call(
        kernel,
        out_shape=jax.ShapeDtypeStruct((b_pad, D), x.dtype),
        grid_spec=pltpu.PrefetchScalarGridSpec(
            num_scalar_prefetch=0,
            grid=(b_pad // tb, n_pad // tn),
            in_specs=[pl.BlockSpec((tb, tn, D), lambda b, k: (b, k, 0))],
            out_specs=pl.BlockSpec((tb, D), lambda b, k: (b, 0)),
            scratch_shapes=[pltpu.VMEM((tb, D), jnp.float32),   # pooled-sum acc
                            pltpu.VMEM((tb, D), jnp.float32)],  # count acc
        ),
        compiler_params=pltpu.CompilerParams(
            dimension_semantics=("parallel", "arbitrary"),
            vmem_limit_bytes=vmem_limit,
        ),
        cost_estimate=cost,
    )(x)
    return out[:B]


def _reference(x):
    mask = (jnp.sum(x, axis=-1) != 0).astype(jnp.float32)      # (B, N)
    num = jnp.sum(mask, axis=1)                                 # (B,)
    s = jnp.sum(x * mask[..., None], axis=1)                    # (B, D)
    avg = s / (num[..., None] + EPS)
    return jnp.nan_to_num(avg, nan=0.0, posinf=1.0, neginf=-1.0)


if __name__ == "__main__":
    key = jax.random.PRNGKey(0)
    k1, k2, k3 = jax.random.split(key, 3)

    # 1) Small case matching the module convention: (batch=2, seq=8, hidden=32).
    B, N, D = 2, 8, 32
    x = jax.random.normal(k1, (B, N, D), dtype=jnp.float32)
    x = x.at[0, 1, :].set(0.0)
    x = x.at[0, 5, :].set(0.0)
    x = x.at[1, 0, :].set(0.0)
    out = jax.block_until_ready(average_non_zero_vectors(x))
    ref = _reference(x)
    assert out.shape == (B, D), out.shape
    assert jnp.allclose(out, ref, atol=1e-5, rtol=1e-5), "mismatch vs reference (small)"

    # 2) Batch padding + multiple batch grid steps + an all-zero batch element.
    B2 = 20
    x2 = jax.random.normal(k2, (B2, N, D), dtype=jnp.float32)
    x2 = x2.at[3].set(0.0)            # entire batch element is zero vectors
    x2 = x2.at[7, 2, :].set(0.0)
    out2 = jax.block_until_ready(
        average_non_zero_vectors(x2, target_tile_bytes=8 * 1024))  # grid=(3, 1)
    ref2 = _reference(x2)
    assert out2.shape == (B2, D), out2.shape
    assert jnp.allclose(out2, ref2, atol=1e-5, rtol=1e-5), "mismatch vs reference (batched)"

    # 3) D=128 exercises the MXU ones-matmul mask path and (with a tiny tile
    #    budget) the N-split "arbitrary" accumulation axis.
    B3, N3, D3 = 4, 32, 128
    x3 = jax.random.normal(k3, (B3, N3, D3), dtype=jnp.float32)
    x3 = x3.at[0, 3, :].set(0.0)
    x3 = x3.at[2].set(0.0)
    out3 = jax.block_until_ready(
        average_non_zero_vectors(x3, target_tile_bytes=32 * 1024))  # grid=(1, 4)
    ref3 = _reference(x3)
    assert out3.shape == (B3, D3), out3.shape
    assert jnp.allclose(out3, ref3, atol=1e-5, rtol=1e-5), "mismatch vs reference (mxu/n-split)"

    print("KERNEL_OK")
</pallas_src>

<mosaic_0001>
module attributes {stable_mosaic.version = 11 : i64} {
  func.func @_avg_nonzero_kernel(%arg0: i32, %arg1: i32, %arg2: memref<8x8x32xf32, #tpu.memory_space<vmem>>, %arg3: memref<8x32xf32, #tpu.memory_space<vmem>>, %arg4: memref<8x32xf32, #tpu.memory_space<vmem>>, %arg5: memref<8x32xf32, #tpu.memory_space<vmem>>) attributes {dimension_semantics = [#tpu.dimension_semantics<parallel>, #tpu.dimension_semantics<arbitrary>], iteration_bounds = array<i64: 1, 1>, scalar_prefetch = 0 : i64, scratch_operands = 2 : i64, tpu.core_type = #tpu.core_type<tc>, window_params = [{transform_indices = @transform_0, window_bounds = array<i64: 8, 8, 32>}, {transform_indices = @transform_1, window_bounds = array<i64: 8, 32>}]} {
    %c0_i32 = arith.constant 0 : i32
    %0 = arith.cmpi eq, %arg1, %c0_i32 : i32
    %1 = arith.extui %0 : i1 to i32
    %c0_i32_0 = arith.constant 0 : i32
    %2 = arith.cmpi ne, %1, %c0_i32_0 : i32
    scf.if %2 {
      %cst_16 = arith.constant 0.000000e+00 : f32
      %24 = vector.broadcast %cst_16 : f32 to vector<8x32xf32>
      %c0_17 = arith.constant 0 : index
      %c0_18 = arith.constant 0 : index
      %25 = vector.load %arg4[%c0_17, %c0_18] : memref<8x32xf32, #tpu.memory_space<vmem>>, vector<8x32xf32>
      tpu.vector_store %arg4[%c0_17, %c0_18], %24 {strides = array<i32>} : memref<8x32xf32, #tpu.memory_space<vmem>>, vector<8x32xf32>,
      %cst_19 = arith.constant 0.000000e+00 : f32
      %26 = vector.broadcast %cst_19 : f32 to vector<8x32xf32>
      %c0_20 = arith.constant 0 : index
      %c0_21 = arith.constant 0 : index
      %27 = vector.load %arg5[%c0_20, %c0_21] : memref<8x32xf32, #tpu.memory_space<vmem>>, vector<8x32xf32>
      tpu.vector_store %arg5[%c0_20, %c0_21], %26 {strides = array<i32>} : memref<8x32xf32, #tpu.memory_space<vmem>>, vector<8x32xf32>,
    } else {
    }
    %c0 = arith.constant 0 : index
    %c0_1 = arith.constant 0 : index
    %c0_2 = arith.constant 0 : index
    %3 = vector.load %arg2[%c0, %c0_1, %c0_2] : memref<8x8x32xf32, #tpu.memory_space<vmem>>, vector<8x8x32xf32>
    %cst = arith.constant dense<0.000000e+00> : vector<8x8xf32>
    %4 = vector.multi_reduction <add>, %3, %cst [2] : vector<8x8x32xf32> to vector<8x8xf32>
    %5 = vector.shape_cast %4 : vector<8x8xf32> to vector<8x8x1xf32>
    %cst_3 = arith.constant 0.000000e+00 : f32
    %6 = vector.broadcast %cst_3 : f32 to vector<8x8x1xf32>
    %7 = arith.cmpf one, %5, %6 : vector<8x8x1xf32>
    %8 = arith.extui %7 : vector<8x8x1xi1> to vector<8x8x1xi32>
    %9 = arith.sitofp %8 : vector<8x8x1xi32> to vector<8x8x1xf32>
    %10 = vector.broadcast %9 : vector<8x8x1xf32> to vector<8x8x32xf32>
    %11 = arith.mulf %3, %10 : vector<8x8x32xf32>
    %c0_4 = arith.constant 0 : index
    %c0_5 = arith.constant 0 : index
    %12 = vector.load %arg4[%c0_4, %c0_5] : memref<8x32xf32, #tpu.memory_space<vmem>>, vector<8x32xf32>
    %cst_6 = arith.constant dense<0.000000e+00> : vector<8x32xf32>
    %13 = vector.multi_reduction <add>, %11, %cst_6 [1] : vector<8x8x32xf32> to vector<8x32xf32>
    %14 = arith.addf %12, %13 : vector<8x32xf32>
    %c0_7 = arith.constant 0 : index
    %c0_8 = arith.constant 0 : index
    %15 = vector.load %arg4[%c0_7, %c0_8] : memref<8x32xf32, #tpu.memory_space<vmem>>, vector<8x32xf32>
    tpu.vector_store %arg4[%c0_7, %c0_8], %14 {strides = array<i32>} : memref<8x32xf32, #tpu.memory_space<vmem>>, vector<8x32xf32>,
    %c0_9 = arith.constant 0 : index
    %c0_10 = arith.constant 0 : index
    %16 = vector.load %arg5[%c0_9, %c0_10] : memref<8x32xf32, #tpu.memory_space<vmem>>, vector<8x32xf32>
    %cst_11 = arith.constant dense<0.000000e+00> : vector<8x1xf32>
    %17 = vector.multi_reduction <add>, %9, %cst_11 [1] : vector<8x8x1xf32> to vector<8x1xf32>
    %18 = vector.broadcast %17 : vector<8x1xf32> to vector<8x32xf32>
    %19 = arith.addf %16, %18 : vector<8x32xf32>
    %c0_12 = arith.constant 0 : index
    %c0_13 = arith.constant 0 : index
    %20 = vector.load %arg5[%c0_12, %c0_13] : memref<8x32xf32, #tpu.memory_space<vmem>>, vector<8x32xf32>
    tpu.vector_store %arg5[%c0_12, %c0_13], %19 {strides = array<i32>} : memref<8x32xf32, #tpu.memory_space<vmem>>, vector<8x32xf32>,
    %c0_i32_14 = arith.constant 0 : i32
    %21 = arith.cmpi eq, %arg1, %c0_i32_14 : i32
    %22 = arith.extui %21 : i1 to i32
    %c0_i32_15 = arith.constant 0 : i32
    %23 = arith.cmpi ne, %22, %c0_i32_15 : i32
    scf.if %23 {
      %c0_16 = arith.constant 0 : index
      %c0_17 = arith.constant 0 : index
      %24 = vector.load %arg4[%c0_16, %c0_17] : memref<8x32xf32, #tpu.memory_space<vmem>>, vector<8x32xf32>
      %c0_18 = arith.constant 0 : index
      %c0_19 = arith.constant 0 : index
      %25 = vector.load %arg5[%c0_18, %c0_19] : memref<8x32xf32, #tpu.memory_space<vmem>>, vector<8x32xf32>
      %cst_20 = arith.constant 9.99999993E-9 : f32
      %26 = vector.broadcast %cst_20 : f32 to vector<8x32xf32>
      %27 = arith.addf %25, %26 : vector<8x32xf32>
      %28 = arith.divf %24, %27 : vector<8x32xf32>
      %29 = arith.cmpf one, %28, %28 : vector<8x32xf32>
      %cst_21 = arith.constant 0.000000e+00 : f32
      %30 = vector.broadcast %cst_21 : f32 to vector<8x32xf32>
      %31 = arith.select %29, %30, %28 : vector<8x32xi1>, vector<8x32xf32>
      %cst_22 = arith.constant 0x7F800000 : f32
      %32 = vector.broadcast %cst_22 : f32 to vector<8x32xf32>
      %33 = arith.cmpf oeq, %31, %32 : vector<8x32xf32>
      %cst_23 = arith.constant 1.000000e+00 : f32
      %34 = vector.broadcast %cst_23 : f32 to vector<8x32xf32>
      %35 = arith.select %33, %34, %31 : vector<8x32xi1>, vector<8x32xf32>
      %cst_24 = arith.constant 0xFF800000 : f32
      %36 = vector.broadcast %cst_24 : f32 to vector<8x32xf32>
      %37 = arith.cmpf oeq, %35, %36 : vector<8x32xf32>
      %cst_25 = arith.constant -1.000000e+00 : f32
      %38 = vector.broadcast %cst_25 : f32 to vector<8x32xf32>
      %39 = arith.select %37, %38, %35 : vector<8x32xi1>, vector<8x32xf32>
      %c0_26 = arith.constant 0 : index
      %c0_27 = arith.constant 0 : index
      %40 = vector.load %arg3[%c0_26, %c0_27] : memref<8x32xf32, #tpu.memory_space<vmem>>, vector<8x32xf32>
      tpu.vector_store %arg3[%c0_26, %c0_27], %39 {strides = array<i32>} : memref<8x32xf32, #tpu.memory_space<vmem>>, vector<8x32xf32>,
    } else {
    }
    return
  }
  func.func @transform_0(%arg0: i32, %arg1: i32) -> (i32, i32, i32) {
    %c0_i32 = arith.constant 0 : i32
    %c0_i32_0 = arith.constant 0 : i32
    return %arg0, %arg1, %c0_i32 : i32, i32, i32
  }
  func.func @transform_1(%arg0: i32, %arg1: i32) -> (i32, i32) {
    %c0_i32 = arith.constant 0 : i32
    %c0_i32_0 = arith.constant 0 : i32
    return %arg0, %c0_i32 : i32, i32
  }
}

</mosaic_0001>

<bundles_post_ra>
// kernel: tpu_custom_call.1
= control target key start
LH: loop header
LB: loop body
LE: loop exit
PB: predicated region body
PF: predicated region fallthrough
CT: control target
= control target key end

     0   :  { %6 = vsyncpa [#allocation5], 0  ;;  %s409_s0 = inlined_call_operand.hbm [shape: f32[8,8,32], index: 0, kind: input, shape index: {}]   ;;  %s410_s1 = inlined_call_operand.hbm [shape: f32[8,32], index: 1, kind: output, shape index: {}]  }
   0x1   :  { %7 = vsyncpa [#allocation6], 0  ;;  %s333_s6 = smov [#allocation4]  }
   0x2   :  { %s13_s7 = sshll.u32 %s333_s6, 4  ;;  %s14_s7 = int_to_ptr.vmem [resolvable:$true] %s13_s7 }
   0x3   :  { %s297_s8 = scalar_lea.vmem %s14_s7, 1024  ;;  %p302_p1 = scmp.lt.s32.totalorder %s14_s7, %s14_s7 }
   0x4   :  { %p298_p0 = scmp.ne.s32.totalorder %s14_s7, %s297_s8  ;;  %p303_p2 = scmp.lt.s32.totalorder %s297_s8, %s297_s8 }
   0x6   :  { %p304_p3 = por %p303_p2, %p302_p1 }
   0x8   :  { %p305_p4 = pnand %p304_p3, %p298_p0 }
   0xa   :  { %308 = shalt.err (!%p305_p4)
}
   0xb   :  { %s334_s9 = smov 128   ;;  %s335_s10 = smov 8  }
   0xc   :  { %19 = dma.hbm_to_vmem [thread:$0]  %s409_s0, 1024, %s14_s7, [#allocation5], %s334_s9, %s334_s9, %s335_s10  }
   0xd   :  { %329 = dma.done.wait [#allocation5], 1024  }
   0xe   :  { %330 = vsyncadd [#allocation5], 4294966272  ;;  %vm27_vm0 = vcmask 261120   ;;  %v336_v0 = vmov 0.0   ;;  %v32_v1 = vld [vmem:[#allocation4 + $0x10] sm:$0xff]  ;;  %v30_v2 = vld [vmem:[#allocation4] sm:$0xff] }
   0xf   :  { %28 = vst.msk [vmem:[#allocation2] sm:$0xff] %vm27_vm0, %v336_v0  ;;  %29 = vst.msk [vmem:[#allocation3] sm:$0xff] %vm27_vm0, %v336_v0  ;;  %v33_v3 = vld [vmem:[#allocation4 + $0x18] sm:$0xff]  ;;  %v45_v4 = vsel %vm27_vm0, %v32_v1, 0.0  ;;  %v39_v5 = vsel %vm27_vm0, %v30_v2, 0.0  ;;  %v31_v6 = vld [vmem:[#allocation4 + $0x8] sm:$0xff] }
  0x10   :  { %46 = vadd.xlane.f32.xlu1 %v45_v4  ;;  %40 = vadd.xlane.f32.xlu0 %v39_v5  ;;  %v48_v7 = vsel %vm27_vm0, %v33_v3, 0.0  ;;  %v42_v8 = vsel %vm27_vm0, %v31_v6, 0.0  ;;  %v359_v9 = vld [vmem:[#allocation4 + $0x28] sm:$0xff]  ;;  %v361_v10 = vld [vmem:[#allocation4 + $0x20] sm:$0xff]  ;;  %v367_v13 = vld [vmem:[#allocation4 + $0x38] sm:$0xff]  ;;  %vm160_vm7 = vcmask 1041409  }
  0x11   :  { %v54_v11 = vsel %vm27_vm0, %v359_v9, 0.0  ;;  %v51_v12 = vsel %vm27_vm0, %v361_v10, 0.0  ;;  %v369_v14 = vld [vmem:[#allocation4 + $0x30] sm:$0xff]  ;;  %v60_v15 = vsel %vm27_vm0, %v367_v13, 0.0  ;;  %vm162_vm9 = vcmask 1042434   ;;  %s337_s0 = smov [#allocation7]  }
  0x12   :  { %v57_v16 = vsel %vm27_vm0, %v369_v14, 0.0  ;;  %vm164_vm10 = vcmask 1043459   ;;  %vm166_vm12 = vcmask 1044484   ;;  %vm168_vm13 = vcmask 1045509   ;;  %s265_s13 = sshll.u32 %s337_s0, 4  ;;  %s266_s13 = int_to_ptr.vmem [resolvable:$true] %s265_s13 }
  0x13   :  { %vm170_vm14 = vcmask 1046534   ;;  %vm172_vm15 = vcmask 1047559   ;;  %s309_s14 = scalar_lea.vmem %s266_s13, 128  ;;  %p314_p6 = scmp.lt.s32.totalorder %s266_s13, %s266_s13 }
  0x14   :  { %49 = vadd.xlane.f32.xlu1 %v48_v7  ;;  %43 = vadd.xlane.f32.xlu0 %v42_v8  ;;  %p310_p5 = scmp.ne.s32.totalorder %s266_s13, %s309_s14  ;;  %p315_p7 = scmp.lt.s32.totalorder %s309_s14, %s309_s14 }
  0x16   :  { %p316_p8 = por %p315_p7, %p314_p6 }
  0x18   :  { %55 = vadd.xlane.f32.xlu1 %v54_v11  ;;  %52 = vadd.xlane.f32.xlu0 %v51_v12  ;;  %p317_p9 = pnand %p316_p8, %p310_p5 }
  0x1c   :  { %61 = vadd.xlane.f32.xlu1 %v60_v15  ;;  %58 = vadd.xlane.f32.xlu0 %v57_v16 }
  0x99   :  { %v47_v17 = vpop.xlane.xlu1 %46  ;;  %v41_v18 = vpop.xlane.xlu0 %40 }
  0x9a   :  { %vm65_vm1 = vcmp.ne.f32.partialorder %v47_v17, 0.0  ;;  %vm63_vm2 = vcmp.ne.f32.partialorder %v41_v18, 0.0 }
  0x9b   :  { %v276_v19 = vsel %vm65_vm1, 1.0, %v336_v0  ;;  %v274_v20 = vsel %vm63_vm2, 1.0, %v336_v0 }
  0x9c   :  { %v89_v21 = vmul.f32 %v276_v19, %v32_v1  ;;  %v190_v22 = vrot.slane %v276_v19, 4  ;;  %v87_v23 = vmul.f32 %v274_v20, %v30_v2  ;;  %v178_v24 = vrot.slane %v274_v20, 4 }
  0x9d   :  { %v50_v25 = vpop.xlane.xlu1 %49  ;;  %v44_v26 = vpop.xlane.xlu0 %43 }
  0x9e   :  { %v110_v27 = vsel %vm27_vm0, %v89_v21, 0.0  ;;  %v191_v28 = vadd.f32 %v276_v19, %v190_v22  ;;  %v96_v29 = vsel %vm27_vm0, %v87_v23, 0.0  ;;  %v179_v30 = vadd.f32 %v274_v20, %v178_v24 }
  0x9f   :  { %v111_v31 = vrot.slane %v110_v27, 4  ;;  %v97_v32 = vrot.slane %v96_v29, 4  ;;  %vm66_vm3 = vcmp.ne.f32.partialorder %v50_v25, 0.0  ;;  %vm64_vm4 = vcmp.ne.f32.partialorder %v44_v26, 0.0 }
  0xa0   :  { %v277_v33 = vsel %vm66_vm3, 1.0, %v336_v0  ;;  %v275_v34 = vsel %vm64_vm4, 1.0, %v336_v0  ;;  %v192_v38 = vrot.slane %v191_v28, 2  ;;  %v180_v41 = vrot.slane %v179_v30, 2 }
  0xa1   :  { %v112_v35 = vadd.f32 %v111_v31, %v110_v27  ;;  %v98_v36 = vadd.f32 %v97_v32, %v96_v29  ;;  %v90_v37 = vmul.f32 %v277_v33, %v33_v3  ;;  %v88_v39 = vmul.f32 %v275_v34, %v31_v6  ;;  %v56_v46 = vpop.xlane.xlu1 %55  ;;  %v53_v50 = vpop.xlane.xlu0 %52 }
  0xa2   :  { %v184_v40 = vrot.slane %v275_v34, 4  ;;  %v196_v43 = vrot.slane %v277_v33, 4  ;;  %v193_v51 = vadd.f32 %v192_v38, %v191_v28  ;;  %v181_v53 = vadd.f32 %v180_v41, %v179_v30 }
  0xa3   :  { %v117_v42 = vsel %vm27_vm0, %v90_v37, 0.0  ;;  %v113_v44 = vrot.slane %v112_v35, 2  ;;  %v103_v45 = vsel %vm27_vm0, %v88_v39, 0.0  ;;  %v99_v47 = vrot.slane %v98_v36, 2 }
  0xa4   :  { %v118_v48 = vrot.slane %v117_v42, 4  ;;  %v104_v49 = vrot.slane %v103_v45, 4  ;;  %v185_v52 = vadd.f32 %v275_v34, %v184_v40  ;;  %v197_v54 = vadd.f32 %v277_v33, %v196_v43 }
  0xa5   :  { %v114_v56 = vadd.f32 %v113_v44, %v112_v35  ;;  %vm68_vm5 = vcmp.ne.f32.partialorder %v56_v46, 0.0  ;;  %vm67_vm6 = vcmp.ne.f32.partialorder %v53_v50, 0.0  ;;  %v100_v58 = vadd.f32 %v99_v47, %v98_v36  ;;  %v62_v2 = vpop.xlane.xlu1 %61  ;;  %v59_v22 = vpop.xlane.xlu0 %58 }
  0xa6   :  { %v105_v55 = vadd.f32 %v104_v49, %v103_v45  ;;  %v186_v57 = vrot.slane %v185_v52, 2  ;;  %v119_v59 = vadd.f32 %v118_v48, %v117_v42  ;;  %v194_v61 = vrot.slane %v193_v51, 1 }
  0xa7   :  { %v279_v63 = vsel %vm68_vm5, 1.0, %v336_v0  ;;  %v278_v1 = vsel %vm67_vm6, 1.0, %v336_v0  ;;  %v198_v3 = vrot.slane %v197_v54, 2  ;;  %v115_v7 = vrot.slane %v114_v56, 1 }
  0xa8   :  { %v106_v60 = vrot.slane %v105_v55, 2  ;;  %v187_v62 = vadd.f32 %v186_v57, %v185_v52  ;;  %v92_v5 = vmul.f32 %v279_v63, %v359_v9  ;;  %v208_v6 = vrot.slane %v279_v63, 4 }
  0xa9   :  { %v182_v8 = vrot.slane %v181_v53, 1  ;;  %v91_v11 = vmul.f32 %v278_v1, %v361_v10  ;;  %v202_v12 = vrot.slane %v278_v1, 4  ;;  %v101_v15 = vrot.slane %v100_v58, 1 }
  0xaa   :  { %v107_v4 = vadd.f32 %v106_v60, %v105_v55  ;;  %v120_v16 = vrot.slane %v119_v59, 2  ;;  %v131_v17 = vsel %vm27_vm0, %v92_v5, 0.0  ;;  %vm70_vm8 = vcmp.ne.f32.partialorder %v62_v2, 0.0 }
  0xab   :  { %v188_v18 = vrot.slane %v187_v62, 1  ;;  %v132_v19 = vrot.slane %v131_v17, 4  ;;  %v209_v20 = vadd.f32 %v279_v63, %v208_v6  ;;  %v124_v21 = vsel %vm27_vm0, %v91_v11, 0.0 }
  0xac   :  { %v199_v23 = vadd.f32 %v198_v3, %v197_v54  ;;  %v108_v9 = vrot.slane %v107_v4, 1  ;;  %v125_v24 = vrot.slane %v124_v21, 4  ;;  %v203_v25 = vadd.f32 %v278_v1, %v202_v12 }
  0xad   :  { %v195_v26 = vadd.f32 %v194_v61, %v193_v51  ;;  %v183_v27 = vadd.f32 %v182_v8, %v181_v53  ;;  %v133_v10 = vadd.f32 %v132_v19, %v131_v17  ;;  %v281_v28 = vsel %vm70_vm8, 1.0, %v336_v0 }
  0xae   :  { %v116_v29 = vadd.f32 %v115_v7, %v114_v56  ;;  %v121_v30 = vadd.f32 %v120_v16, %v119_v59  ;;  %v126_v31 = vadd.f32 %v125_v24, %v124_v21  ;;  %vm69_vm11 = vcmp.ne.f32.partialorder %v59_v22, 0.0 }
  0xaf   :  { %v102_v32 = vadd.f32 %v101_v15, %v100_v58  ;;  %v189_v33 = vadd.f32 %v188_v18, %v187_v62  ;;  %v210_v34 = vrot.slane %v209_v20, 2  ;;  %v204_v35 = vrot.slane %v203_v25, 2 }
  0xb0   :  { %v200_v36 = vrot.slane %v199_v23, 1  ;;  %v109_v37 = vadd.f32 %v108_v9, %v107_v4  ;;  %v127_v38 = vrot.slane %v126_v31, 2  ;;  %v94_v39 = vmul.f32 %v281_v28, %v367_v13 }
  0xb1   :  { %v134_v40 = vrot.slane %v133_v10, 2  ;;  %v205_v41 = vadd.f32 %v204_v35, %v203_v25  ;;  %v220_v42 = vrot.slane %v281_v28, 4  ;;  %v280_v43 = vsel %vm69_vm11, 1.0, %v336_v0 }
  0xb2   :  { %v122_v44 = vrot.slane %v121_v30, 1  ;;  %v128_v45 = vadd.f32 %v127_v38, %v126_v31  ;;  %v145_v46 = vsel %vm27_vm0, %v94_v39, 0.0  ;;  %v93_v47 = vmul.f32 %v280_v43, %v369_v14 }
  0xb3   :  { %v234_v48 = vsel %vm160_vm7, %v189_v33, %v183_v27  ;;  %v211_v49 = vadd.f32 %v210_v34, %v209_v20  ;;  %v146_v50 = vrot.slane %v145_v46, 4  ;;  %v221_v51 = vadd.f32 %v281_v28, %v220_v42  ;;  %v177_v28 = vld [vmem:[#allocation3] sm:$0xff] }
  0xb4   :  { %v201_v52 = vadd.f32 %v200_v36, %v199_v23  ;;  %v206_v53 = vrot.slane %v205_v41, 1  ;;  %v138_v13 = vsel %vm27_vm0, %v93_v47, 0.0  ;;  %v214_v54 = vrot.slane %v280_v43, 4 }
  0xb5   :  { %v161_v55 = vsel %vm160_vm7, %v109_v37, %v102_v32  ;;  %v135_v56 = vadd.f32 %v134_v40, %v133_v10  ;;  %v147_v0 = vadd.f32 %v146_v50, %v145_v46  ;;  %v222_v57 = vrot.slane %v221_v51, 2  ;;  %v95_v32 = vld [vmem:[#allocation2] sm:$0xff] }
  0xb6   :  { %v235_v58 = vsel %vm162_vm9, %v195_v26, %v234_v48  ;;  %v129_v59 = vrot.slane %v128_v45, 1  ;;  %v139_v60 = vrot.slane %v138_v13, 4  ;;  %v215_v14 = vadd.f32 %v280_v43, %v214_v54 }
  0xb7   :  { %v123_v61 = vadd.f32 %v122_v44, %v121_v30  ;;  %v212_v62 = vrot.slane %v211_v49, 1  ;;  %v148_v63 = vrot.slane %v147_v0, 2  ;;  %v223_v1 = vadd.f32 %v222_v57, %v221_v51 }
  0xb8   :  { %v163_v2 = vsel %vm162_vm9, %v116_v29, %v161_v55  ;;  %v207_v3 = vadd.f32 %v206_v53, %v205_v41  ;;  %v140_v4 = vadd.f32 %v139_v60, %v138_v13  ;;  %v216_v5 = vrot.slane %v215_v14, 2 }
  0xb9   :  { %v136_v6 = vrot.slane %v135_v56, 1  ;;  %v236_v7 = vsel %vm164_vm10, %v201_v52, %v235_v58  ;;  %v149_v8 = vadd.f32 %v148_v63, %v147_v0  ;;  %v224_v11 = vrot.slane %v223_v1, 1 }
  0xba   :  { %v130_v12 = vadd.f32 %v129_v59, %v128_v45  ;;  %v141_v15 = vrot.slane %v140_v4, 2  ;;  %v217_v16 = vadd.f32 %v216_v5, %v215_v14  ;;  %v213_v17 = vadd.f32 %v212_v62, %v211_v49 }
  0xbb   :  { %v165_v18 = vsel %vm164_vm10, %v123_v61, %v163_v2  ;;  %v150_v19 = vrot.slane %v149_v8, 1  ;;  %v237_v20 = vsel %vm166_vm12, %v207_v3, %v236_v7  ;;  %v137_v23 = vadd.f32 %v136_v6, %v135_v56 }
  0xbc   :  { %v142_v21 = vadd.f32 %v141_v15, %v140_v4  ;;  %v218_v22 = vrot.slane %v217_v16, 1  ;;  %v225_v9 = vadd.f32 %v224_v11, %v223_v1  ;;  %v167_v24 = vsel %vm166_vm12, %v130_v12, %v165_v18 }
  0xbd   :  { %v151_v27 = vadd.f32 %v150_v19, %v149_v8  ;;  %v238_v10 = vsel %vm168_vm13, %v213_v17, %v237_v20  ;;  %v169_v31 = vsel %vm168_vm13, %v137_v23, %v167_v24 }
  0xbe   :  { %v143_v25 = vrot.slane %v142_v21, 1  ;;  %v219_v26 = vadd.f32 %v218_v22, %v217_v16 }
  0xc0   :  { %v144_v29 = vadd.f32 %v143_v25, %v142_v21  ;;  %v239_v30 = vsel %vm170_vm14, %v219_v26, %v238_v10 }
  0xc1   :  { %v240_v33 = vsel %vm172_vm15, %v225_v9, %v239_v30 }
  0xc2   :  { %v171_v34 = vsel %vm170_vm14, %v144_v29, %v169_v31  ;;  %v242_v35 = vadd.f32 %v240_v33, %v177_v28 }
  0xc3   :  { %v173_v36 = vsel %vm172_vm15, %v151_v27, %v171_v34 }
  0xc4   :  { %v175_v37 = vadd.f32 %v173_v36, %v95_v32  ;;  %243 = vst.msk [vmem:[#allocation3] sm:$0xff] %vm27_vm0, %v242_v35 }
  0xc6   :  { %176 = vst.msk [vmem:[#allocation2] sm:$0xff] %vm27_vm0, %v175_v37 }
  0xcb   :  { %v248_v38 = vld [vmem:[#allocation3] sm:$0xff] }
  0xcc   :  { %v249_v39 = vadd.f32 1e-08, %v248_v38 }
  0xcd   :  { %v247_v41 = vld [vmem:[#allocation2] sm:$0xff] }
  0xce   :  { %287 = vrcp.f32 %v249_v39 }
  0xdb   :  { %v288_v40 = vpop.eup %287 }
  0xdc   :  { %v251_v42 = vmul.f32 %v288_v40, %v247_v41 }
  0xde   :  { %vm252_vm1 = vcmp.ne.f32.partialorder %v251_v42, %v251_v42 }
  0xdf   :  { %v253_v43 = vsel %vm252_vm1, 0.0, %v251_v42 }
  0xe0   :  { %vm254_vm2 = vcmp.eq.f32.partialorder %v253_v43, inf }
  0xe1   :  { %v255_v44 = vsel %vm254_vm2, 1.0, %v253_v43 }
  0xe2   :  { %vm256_vm3 = vcmp.eq.f32.partialorder %v255_v44, -inf }
  0xe3   :  { %v257_v45 = vsel %vm256_vm3, -1.0, %v255_v44 }
  0xe4   :  { %258 = vst.msk [vmem:[#allocation7] sm:$0xff] %vm27_vm0, %v257_v45 }
  0xe5   :  { %320 = shalt.err (!%p317_p9)
}
  0xe6   :  { %268 = dma.vmem_to_hbm [thread:$0]  %s266_s13, 128, %s410_s1, [#allocation6]  }
  0xe7   :  { %331 = dma.done.wait [#allocation6], 128  }
  0xe8   :  { %332 = vsyncadd [#allocation6], 4294967168 }
  0xe9   :  { %272 = vsyncpa [#allocation5], 1 }
  0xea   :  { %273 = vsyncpa [#allocation6], 1 }

</bundles_post_ra>
